<compile_context>
chip_gen: v7x
topology: tpu7x:2x2x1
jax: 0.10.0
libtpu: 0.0.40
codegen_flags: <defaults>
</compile_context>

<pallas_src>
import functools

import jax
import jax.numpy as jnp
import numpy as np
from jax.experimental import pallas as pl
from jax.experimental.pallas import tpu as pltpu

# ----------------------------- problem sizes (small, synthetic) ---------------
N   = 512   # number of patch instances in the bag
TN  = 128   # instances per grid step (tile of the N axis)
D0  = 256   # input feature dim (size[0])
D1  = 128   # hidden dim (size[1])
D2  = 128   # attention dim (size[2])
DT  = 768   # CLIP text embedding dim (hard-coded in the module)
NC  = 2     # n_classes

# packed row-parameter buffer layout (all offsets 128-lane aligned)
OFF_B1  = 0                       # b1   : D1     lanes
OFF_BAB = OFF_B1 + D1             # ba|bb: 2*D2   lanes
OFF_WC  = OFF_BAB + 2 * D2        # wc^T : D2     lanes
OFF_BC  = OFF_WC + D2             # bc   : 1      lane
VEC_PAD = OFF_BC + 128            # pad to lane multiple -> 640


# ----------------------------- fused streaming kernel -------------------------
def chief_kernel(h_ref, w1_ref, wab_ref, vec_ref,
                 araw_ref, pooled_ref,
                 m_sc, l_sc, acc_sc):
    i = pl.program_id(0)

    # static, lane-aligned slices of the packed row-parameter buffer
    b1  = vec_ref[:, OFF_B1:OFF_B1 + D1]           # [1, D1]
    bab = vec_ref[:, OFF_BAB:OFF_BAB + 2 * D2]     # [1, 2*D2]
    wc  = vec_ref[:, OFF_WC:OFF_WC + D2]           # [1, D2]
    bc  = vec_ref[:, OFF_BC:OFF_BC + 1]            # [1, 1]

    @pl.when(i == 0)
    def _():
        m_sc[...] = jnp.full_like(m_sc, -jnp.inf)
        l_sc[...] = jnp.zeros_like(l_sc)
        acc_sc[...] = jnp.zeros_like(acc_sc)

    # instance MLP: h1 = ReLU(h @ W1 + b1)            (eval-mode dropout = no-op)
    h1 = jnp.maximum(
        jnp.dot(h_ref[...], w1_ref[...], preferred_element_type=jnp.float32)
        + b1, 0.0)                                                    # [TN, D1]

    # gated attention: ONE 256-wide matmul, split into tanh / sigmoid halves
    ab = jnp.dot(h1, wab_ref[...], preferred_element_type=jnp.float32) + bab
    gated = jnp.tanh(ab[:, :D2]) * jax.nn.sigmoid(ab[:, D2:])         # [TN, D2]

    # attention scores, lane-dense: (gated @ wc_col + bc)^T == wc_row @ gated^T + bc
    a_raw = jax.lax.dot_general(
        wc, gated, (((1,), (1,)), ((), ())),
        preferred_element_type=jnp.float32) + bc                      # [1, TN]
    araw_ref[...] = a_raw

    # online softmax + attention pooling (flash-style running max / sum / rescale)
    m_prev = m_sc[...]
    m_new = jnp.maximum(m_prev, jnp.max(a_raw, axis=-1, keepdims=True))
    scale = jnp.exp(m_prev - m_new)
    p = jnp.exp(a_raw - m_new)                                        # [1, TN]
    l_sc[...] = scale * l_sc[...] + jnp.sum(p, axis=-1, keepdims=True)
    acc_sc[...] = scale * acc_sc[...] + jnp.dot(
        p, h1, preferred_element_type=jnp.float32)                    # [1, D1]
    m_sc[...] = m_new

    @pl.when(i == pl.num_programs(0) - 1)
    def _():
        # exact division (no approx reciprocal) to stay within 1e-4 of the reference
        pooled_ref[...] = acc_sc[...] / l_sc[...]


_chief_call = pl.pallas_call(
    chief_kernel,
    out_shape=(jax.ShapeDtypeStruct((1, N), jnp.float32),     # attention_raw  [1, N]
               jax.ShapeDtypeStruct((1, D1), jnp.float32)),   # softmax(A) @ h1 [1, D1]
    grid_spec=pltpu.PrefetchScalarGridSpec(
        num_scalar_prefetch=0,
        grid=(N // TN,),
        in_specs=[
            pl.BlockSpec((TN, D0), lambda i: (i, 0)),          # h streams tile-by-tile
            pl.BlockSpec((D0, D1), lambda i: (0, 0)),          # w1 resident (DMA once)
            pl.BlockSpec((D1, 2 * D2), lambda i: (0, 0)),      # [wa|wb] resident
            pl.BlockSpec((1, VEC_PAD), lambda i: (0, 0)),      # packed biases + wc_row
        ],
        out_specs=[
            pl.BlockSpec((1, TN), lambda i: (0, i)),           # lane-dense A_raw tile
            pl.BlockSpec((1, D1), lambda i: (0, 0)),           # pooled (written last step)
        ],
        scratch_shapes=[
            pltpu.VMEM((1, 1), jnp.float32),                   # running max
            pltpu.VMEM((1, 1), jnp.float32),                   # running sum
            pltpu.VMEM((1, D1), jnp.float32),                  # running pooled accumulator
        ]),
    compiler_params=pltpu.CompilerParams(
        dimension_semantics=("arbitrary",)),                   # N axis is a reduction
)


# ----------------------------- wrapper (glue) ---------------------------------
def prep_kernel_params(p):
    """Pack the per-layer params into the fused layout the kernel expects."""
    vec = jnp.zeros((1, VEC_PAD), jnp.float32)
    vec = vec.at[:, OFF_B1:OFF_B1 + D1].set(p["b1"])
    vec = vec.at[:, OFF_BAB:OFF_BAB + 2 * D2].set(
        jnp.concatenate([p["ba"], p["bb"]], axis=1))
    vec = vec.at[:, OFF_WC:OFF_WC + D2].set(jnp.transpose(p["wc"], (1, 0)))
    vec = vec.at[:, OFF_BC:OFF_BC + 1].set(p["bc"])
    return {
        "w1":   p["w1"],
        "wab":  jnp.concatenate([p["wa"], p["wb"]], axis=1),   # (D1, 2*D2)
        "vec":  vec,                                           # (1, VEC_PAD)
        # kept in the wrapper (hoisted out of the kernel):
        "wt":   p["wt"],   "bt":   p["bt"],
        "wcls": p["wcls"], "bcls": p["bcls"],
    }


@functools.partial(jax.jit, static_argnames=())
def chief_forward(h, text_embed, kp):
    a_raw, pooled = _chief_call(h, kp["w1"], kp["wab"], kp["vec"])
    # text_to_vision (eval-mode dropout = no-op) — hoisted: tiny M=1 GEMV, XLA handles it
    embed = jnp.maximum(text_embed @ kp["wt"] + kp["bt"], 0.0)
    M = pooled + embed
    # bag classifier tail — hoisted: ~512 FLOPs, avoids a lane-sparse [1,2] kernel output
    logits = M @ kp["wcls"] + kp["bcls"]
    Y_prob = jax.nn.softmax(logits, axis=1)
    Y_hat = jnp.argmax(logits, axis=1, keepdims=True)
    return {"bag_logits": logits, "attention_raw": a_raw, "M": M,
            "Y_prob": Y_prob, "Y_hat": Y_hat}


# ----------------------------- pure-JAX reference -----------------------------
def chief_reference(h, text_embed, p):
    h1 = jnp.maximum(h @ p["w1"] + p["b1"], 0.0)
    a = jnp.tanh(h1 @ p["wa"] + p["ba"])
    b = jax.nn.sigmoid(h1 @ p["wb"] + p["bb"])
    A = (a * b) @ p["wc"] + p["bc"]                          # [N,1]
    A_raw = A.T                                              # [1,N]
    A_sm = jax.nn.softmax(A_raw, axis=1)
    embed = jnp.maximum(text_embed @ p["wt"] + p["bt"], 0.0)
    M = A_sm @ h1 + embed
    logits = M @ p["wcls"] + p["bcls"]
    return {"bag_logits": logits, "attention_raw": A_raw, "M": M,
            "Y_prob": jax.nn.softmax(logits, axis=1)}


# ----------------------------- deterministic params ---------------------------
def make_params(key):
    ks = jax.random.split(key, 16)
    s = 0.05
    return {
        # attention_net.fc1
        "w1":  s * jax.random.normal(ks[0], (D0, D1), jnp.float32),
        "b1":  s * jax.random.normal(ks[1], (1, D1), jnp.float32),
        # Attn_Net_Gated.attention_a / attention_b / attention_c
        "wa":  s * jax.random.normal(ks[2], (D1, D2), jnp.float32),
        "ba":  s * jax.random.normal(ks[3], (1, D2), jnp.float32),
        "wb":  s * jax.random.normal(ks[4], (D1, D2), jnp.float32),
        "bb":  s * jax.random.normal(ks[5], (1, D2), jnp.float32),
        "wc":  s * jax.random.normal(ks[6], (D2, 1), jnp.float32),
        "bc":  s * jax.random.normal(ks[7], (1, 1), jnp.float32),
        # text_to_vision
        "wt":  s * jax.random.normal(ks[8], (DT, D1), jnp.float32),
        "bt":  s * jax.random.normal(ks[9], (1, D1), jnp.float32),
        # bag classifier
        "wcls": s * jax.random.normal(ks[10], (D1, NC), jnp.float32),
        "bcls": s * jax.random.normal(ks[11], (1, NC), jnp.float32),
    }


if __name__ == "__main__":
    key = jax.random.PRNGKey(0)
    kh, kt, kp = jax.random.split(key, 3)
    h = jax.random.normal(kh, (N, D0), jnp.float32)           # bag of patch features
    text_embed = jax.random.normal(kt, (1, DT), jnp.float32)  # CLIP pooled text embedding
    params = make_params(kp)
    kparams = prep_kernel_params(params)

    out = chief_forward(h, text_embed, kparams)
    out = jax.tree_util.tree_map(jax.block_until_ready, out)

    ref = chief_reference(h, text_embed, params)
    np.testing.assert_allclose(np.asarray(out["attention_raw"]),
                               np.asarray(ref["attention_raw"]), atol=1e-4, rtol=1e-4)
    np.testing.assert_allclose(np.asarray(out["M"]),
                               np.asarray(ref["M"]), atol=1e-4, rtol=1e-4)
    np.testing.assert_allclose(np.asarray(out["bag_logits"]),
                               np.asarray(ref["bag_logits"]), atol=1e-4, rtol=1e-4)
    np.testing.assert_allclose(np.asarray(out["Y_prob"]),
                               np.asarray(ref["Y_prob"]), atol=1e-4, rtol=1e-4)

    print("KERNEL_OK")
</pallas_src>

<mosaic_0001>
module attributes {stable_mosaic.version = 11 : i64} {
  func.func @chief_kernel(%arg0: i32, %arg1: memref<128x256xf32, #tpu.memory_space<vmem>>, %arg2: memref<256x128xf32, #tpu.memory_space<vmem>>, %arg3: memref<128x256xf32, #tpu.memory_space<vmem>>, %arg4: memref<1x640xf32, #tpu.memory_space<vmem>>, %arg5: memref<1x128xf32, #tpu.memory_space<vmem>>, %arg6: memref<1x128xf32, #tpu.memory_space<vmem>>, %arg7: memref<1x1xf32, #tpu.memory_space<vmem>>, %arg8: memref<1x1xf32, #tpu.memory_space<vmem>>, %arg9: memref<1x128xf32, #tpu.memory_space<vmem>>) attributes {dimension_semantics = [#tpu.dimension_semantics<arbitrary>], iteration_bounds = array<i64: 4>, scalar_prefetch = 0 : i64, scratch_operands = 3 : i64, tpu.core_type = #tpu.core_type<tc>, window_params = [{transform_indices = @transform_0, window_bounds = array<i64: 128, 256>}, {pipeline_mode = #tpu.pipeline_mode<synchronous>, transform_indices = @transform_1, window_bounds = array<i64: 256, 128>}, {pipeline_mode = #tpu.pipeline_mode<synchronous>, transform_indices = @transform_2, window_bounds = array<i64: 128, 256>}, {pipeline_mode = #tpu.pipeline_mode<synchronous>, transform_indices = @transform_3, window_bounds = array<i64: 1, 640>}, {transform_indices = @transform_4, window_bounds = array<i64: 1, 128>}, {pipeline_mode = #tpu.pipeline_mode<synchronous>, transform_indices = @transform_5, window_bounds = array<i64: 1, 128>}]} {
    %c0 = arith.constant 0 : index
    %c0_0 = arith.constant 0 : index
    %0 = vector.load %arg4[%c0, %c0_0] : memref<1x640xf32, #tpu.memory_space<vmem>>, vector<1x128xf32>
    %c0_1 = arith.constant 0 : index
    %c128 = arith.constant 128 : index
    %1 = vector.load %arg4[%c0_1, %c128] : memref<1x640xf32, #tpu.memory_space<vmem>>, vector<1x256xf32>
    %c0_2 = arith.constant 0 : index
    %c384 = arith.constant 384 : index
    %2 = vector.load %arg4[%c0_2, %c384] : memref<1x640xf32, #tpu.memory_space<vmem>>, vector<1x128xf32>
    %c0_3 = arith.constant 0 : index
    %c512 = arith.constant 512 : index
    %3 = vector.load %arg4[%c0_3, %c512] : memref<1x640xf32, #tpu.memory_space<vmem>>, vector<1x1xf32>
    %c0_i32 = arith.constant 0 : i32
    %4 = arith.cmpi eq, %arg0, %c0_i32 : i32
    %5 = arith.extui %4 : i1 to i32
    %c0_i32_4 = arith.constant 0 : i32
    %6 = arith.cmpi ne, %5, %c0_i32_4 : i32
    scf.if %6 {
      %cst_33 = arith.constant 0xFF800000 : f32
      %56 = vector.broadcast %cst_33 : f32 to vector<1x1xf32>
      %c0_34 = arith.constant 0 : index
      %c0_35 = arith.constant 0 : index
      %57 = vector.load %arg7[%c0_34, %c0_35] : memref<1x1xf32, #tpu.memory_space<vmem>>, vector<1x1xf32>
      tpu.vector_store %arg7[%c0_34, %c0_35], %56 {strides = array<i32>} : memref<1x1xf32, #tpu.memory_space<vmem>>, vector<1x1xf32>,
      %cst_36 = arith.constant 0.000000e+00 : f32
      %58 = vector.broadcast %cst_36 : f32 to vector<1x1xf32>
      %c0_37 = arith.constant 0 : index
      %c0_38 = arith.constant 0 : index
      %59 = vector.load %arg8[%c0_37, %c0_38] : memref<1x1xf32, #tpu.memory_space<vmem>>, vector<1x1xf32>
      tpu.vector_store %arg8[%c0_37, %c0_38], %58 {strides = array<i32>} : memref<1x1xf32, #tpu.memory_space<vmem>>, vector<1x1xf32>,
      %cst_39 = arith.constant 0.000000e+00 : f32
      %60 = vector.broadcast %cst_39 : f32 to vector<1x128xf32>
      %c0_40 = arith.constant 0 : index
      %c0_41 = arith.constant 0 : index
      %61 = vector.load %arg9[%c0_40, %c0_41] : memref<1x128xf32, #tpu.memory_space<vmem>>, vector<1x128xf32>
      tpu.vector_store %arg9[%c0_40, %c0_41], %60 {strides = array<i32>} : memref<1x128xf32, #tpu.memory_space<vmem>>, vector<1x128xf32>,
    } else {
    }
    %c0_5 = arith.constant 0 : index
    %c0_6 = arith.constant 0 : index
    %7 = vector.load %arg1[%c0_5, %c0_6] : memref<128x256xf32, #tpu.memory_space<vmem>>, vector<128x256xf32>
    %c0_7 = arith.constant 0 : index
    %c0_8 = arith.constant 0 : index
    %8 = vector.load %arg2[%c0_7, %c0_8] : memref<256x128xf32, #tpu.memory_space<vmem>>, vector<256x128xf32>
    %cst = arith.constant dense<0.000000e+00> : vector<128x128xf32>
    %9 = tpu.matmul %7, %8, %cst {dimension_numbers = #tpu.dot_dimension_numbers<[1], [0], [0], [1], [0, 0, 1, 1], [], []>} : vector<128x256xf32>, vector<256x128xf32>, vector<128x128xf32> -> vector<128x128xf32>
    %10 = vector.broadcast %0 : vector<1x128xf32> to vector<128x128xf32>
    %11 = arith.addf %9, %10 : vector<128x128xf32>
    %cst_9 = arith.constant 0.000000e+00 : f32
    %12 = vector.broadcast %cst_9 : f32 to vector<128x128xf32>
    %13 = arith.maximumf %11, %12 : vector<128x128xf32>
    %c0_10 = arith.constant 0 : index
    %c0_11 = arith.constant 0 : index
    %14 = vector.load %arg3[%c0_10, %c0_11] : memref<128x256xf32, #tpu.memory_space<vmem>>, vector<128x256xf32>
    %cst_12 = arith.constant dense<0.000000e+00> : vector<128x256xf32>
    %15 = tpu.matmul %13, %14, %cst_12 {dimension_numbers = #tpu.dot_dimension_numbers<[1], [0], [0], [1], [0, 0, 1, 1], [], []>} : vector<128x128xf32>, vector<128x256xf32>, vector<128x256xf32> -> vector<128x256xf32>
    %16 = vector.broadcast %1 : vector<1x256xf32> to vector<128x256xf32>
    %17 = arith.addf %15, %16 : vector<128x256xf32>
    %18 = vector.extract_strided_slice %17 {offsets = [0, 0], sizes = [128, 128], strides = [1, 1]} : vector<128x256xf32> to vector<128x128xf32>
    %19 = math.tanh %18 : vector<128x128xf32>
    %20 = vector.extract_strided_slice %17 {offsets = [0, 128], sizes = [128, 128], strides = [1, 1]} : vector<128x256xf32> to vector<128x128xf32>
    %21 = arith.negf %20 : vector<128x128xf32>
    %22 = math.exp %21 : vector<128x128xf32>
    %cst_13 = arith.constant 1.000000e+00 : f32
    %23 = vector.broadcast %cst_13 : f32 to vector<128x128xf32>
    %24 = arith.addf %23, %22 : vector<128x128xf32>
    %25 = arith.divf %23, %24 : vector<128x128xf32>
    %26 = arith.mulf %19, %25 : vector<128x128xf32>
    %cst_14 = arith.constant dense<0.000000e+00> : vector<1x128xf32>
    %27 = tpu.matmul %2, %26, %cst_14 {dimension_numbers = #tpu.dot_dimension_numbers<[1], [1], [0], [0], [0, 0, 1, 0], [], []>} : vector<1x128xf32>, vector<128x128xf32>, vector<1x128xf32> -> vector<1x128xf32>
    %28 = vector.broadcast %3 : vector<1x1xf32> to vector<1x128xf32>
    %29 = arith.addf %27, %28 : vector<1x128xf32>
    %c0_15 = arith.constant 0 : index
    %c0_16 = arith.constant 0 : index
    %30 = vector.load %arg5[%c0_15, %c0_16] : memref<1x128xf32, #tpu.memory_space<vmem>>, vector<1x128xf32>
    tpu.vector_store %arg5[%c0_15, %c0_16], %29 {strides = array<i32>} : memref<1x128xf32, #tpu.memory_space<vmem>>, vector<1x128xf32>,
    %c0_17 = arith.constant 0 : index
    %c0_18 = arith.constant 0 : index
    %31 = vector.load %arg7[%c0_17, %c0_18] : memref<1x1xf32, #tpu.memory_space<vmem>>, vector<1x1xf32>
    %cst_19 = arith.constant dense<0xFF800000> : vector<1xf32>
    %32 = vector.multi_reduction <maximumf>, %29, %cst_19 [1] : vector<1x128xf32> to vector<1xf32>
    %33 = vector.shape_cast %32 : vector<1xf32> to vector<1x1xf32>
    %34 = arith.maximumf %31, %33 : vector<1x1xf32>
    %35 = arith.subf %31, %34 : vector<1x1xf32>
    %36 = math.exp %35 : vector<1x1xf32>
    %37 = vector.broadcast %34 : vector<1x1xf32> to vector<1x128xf32>
    %38 = arith.subf %29, %37 : vector<1x128xf32>
    %39 = math.exp %38 : vector<1x128xf32>
    %c0_20 = arith.constant 0 : index
    %c0_21 = arith.constant 0 : index
    %40 = vector.load %arg8[%c0_20, %c0_21] : memref<1x1xf32, #tpu.memory_space<vmem>>, vector<1x1xf32>
    %41 = arith.mulf %36, %40 : vector<1x1xf32>
    %cst_22 = arith.constant dense<0.000000e+00> : vector<1xf32>
    %42 = vector.multi_reduction <add>, %39, %cst_22 [1] : vector<1x128xf32> to vector<1xf32>
    %43 = vector.shape_cast %42 : vector<1xf32> to vector<1x1xf32>
    %44 = arith.addf %41, %43 : vector<1x1xf32>
    %c0_23 = arith.constant 0 : index
    %c0_24 = arith.constant 0 : index
    %45 = vector.load %arg8[%c0_23, %c0_24] : memref<1x1xf32, #tpu.memory_space<vmem>>, vector<1x1xf32>
    tpu.vector_store %arg8[%c0_23, %c0_24], %44 {strides = array<i32>} : memref<1x1xf32, #tpu.memory_space<vmem>>, vector<1x1xf32>,
    %c0_25 = arith.constant 0 : index
    %c0_26 = arith.constant 0 : index
    %46 = vector.load %arg9[%c0_25, %c0_26] : memref<1x128xf32, #tpu.memory_space<vmem>>, vector<1x128xf32>
    %47 = vector.broadcast %36 : vector<1x1xf32> to vector<1x128xf32>
    %48 = arith.mulf %47, %46 : vector<1x128xf32>
    %cst_27 = arith.constant dense<0.000000e+00> : vector<1x128xf32>
    %49 = tpu.matmul %39, %13, %cst_27 {dimension_numbers = #tpu.dot_dimension_numbers<[1], [0], [0], [1], [0, 0, 1, 1], [], []>} : vector<1x128xf32>, vector<128x128xf32>, vector<1x128xf32> -> vector<1x128xf32>
    %50 = arith.addf %48, %49 : vector<1x128xf32>
    %c0_28 = arith.constant 0 : index
    %c0_29 = arith.constant 0 : index
    %51 = vector.load %arg9[%c0_28, %c0_29] : memref<1x128xf32, #tpu.memory_space<vmem>>, vector<1x128xf32>
    tpu.vector_store %arg9[%c0_28, %c0_29], %50 {strides = array<i32>} : memref<1x128xf32, #tpu.memory_space<vmem>>, vector<1x128xf32>,
    %c0_30 = arith.constant 0 : index
    %c0_31 = arith.constant 0 : index
    %52 = vector.load %arg7[%c0_30, %c0_31] : memref<1x1xf32, #tpu.memory_space<vmem>>, vector<1x1xf32>
    tpu.vector_store %arg7[%c0_30, %c0_31], %34 {strides = array<i32>} : memref<1x1xf32, #tpu.memory_space<vmem>>, vector<1x1xf32>,
    %c3_i32 = arith.constant 3 : i32
    %53 = arith.cmpi eq, %arg0, %c3_i32 : i32
    %54 = arith.extui %53 : i1 to i32
    %c0_i32_32 = arith.constant 0 : i32
    %55 = arith.cmpi ne, %54, %c0_i32_32 : i32
    scf.if %55 {
      %c0_33 = arith.constant 0 : index
      %c0_34 = arith.constant 0 : index
      %56 = vector.load %arg9[%c0_33, %c0_34] : memref<1x128xf32, #tpu.memory_space<vmem>>, vector<1x128xf32>
      %c0_35 = arith.constant 0 : index
      %c0_36 = arith.constant 0 : index
      %57 = vector.load %arg8[%c0_35, %c0_36] : memref<1x1xf32, #tpu.memory_space<vmem>>, vector<1x1xf32>
      %58 = vector.broadcast %57 : vector<1x1xf32> to vector<1x128xf32>
      %59 = arith.divf %56, %58 : vector<1x128xf32>
      %c0_37 = arith.constant 0 : index
      %c0_38 = arith.constant 0 : index
      %60 = vector.load %arg6[%c0_37, %c0_38] : memref<1x128xf32, #tpu.memory_space<vmem>>, vector<1x128xf32>
      tpu.vector_store %arg6[%c0_37, %c0_38], %59 {strides = array<i32>} : memref<1x128xf32, #tpu.memory_space<vmem>>, vector<1x128xf32>,
    } else {
    }
    return
  }
  func.func @transform_0(%arg0: i32) -> (i32, i32) {
    %c0_i32 = arith.constant 0 : i32
    %c0_i32_0 = arith.constant 0 : i32
    return %arg0, %c0_i32 : i32, i32
  }
  func.func @transform_1(%arg0: i32) -> (i32, i32) {
    %c0_i32 = arith.constant 0 : i32
    %c0_i32_0 = arith.constant 0 : i32
    %c0_i32_1 = arith.constant 0 : i32
    return %c0_i32, %c0_i32_0 : i32, i32
  }
  func.func @transform_2(%arg0: i32) -> (i32, i32) {
    %c0_i32 = arith.constant 0 : i32
    %c0_i32_0 = arith.constant 0 : i32
    %c0_i32_1 = arith.constant 0 : i32
    return %c0_i32, %c0_i32_0 : i32, i32
  }
  func.func @transform_3(%arg0: i32) -> (i32, i32) {
    %c0_i32 = arith.constant 0 : i32
    %c0_i32_0 = arith.constant 0 : i32
    %c0_i32_1 = arith.constant 0 : i32
    return %c0_i32, %c0_i32_0 : i32, i32
  }
  func.func @transform_4(%arg0: i32) -> (i32, i32) {
    %c0_i32 = arith.constant 0 : i32
    %c0_i32_0 = arith.constant 0 : i32
    return %c0_i32, %arg0 : i32, i32
  }
  func.func @transform_5(%arg0: i32) -> (i32, i32) {
    %c0_i32 = arith.constant 0 : i32
    %c0_i32_0 = arith.constant 0 : i32
    %c0_i32_1 = arith.constant 0 : i32
    return %c0_i32, %c0_i32_0 : i32, i32
  }
}

</mosaic_0001>

<bundles_post_ra>
// kernel: chief_forward.1
= control target key start
LH: loop header
LB: loop body
LE: loop exit
PB: predicated region body
PF: predicated region fallthrough
CT: control target
= control target key end

     0   :  { %11 = vsyncpa [#allocation6], 0  ;;  %s2270_s0 = inlined_call_operand.hbm [shape: f32[512,256], index: 0, kind: input, shape index: {}]   ;;  %s2271_s1 = inlined_call_operand.hbm [shape: f32[256,128], index: 1, kind: input, shape index: {}]   ;;  %s2272_s2 = inlined_call_operand.hbm [shape: f32[128,256], index: 2, kind: input, shape index: {}]   ;;  %s2273_s3 = inlined_call_operand.vmem [shape: f32[1,640], index: 3, kind: input, shape index: {}]   ;;  %s2274_s4 = inlined_call_operand.hbm [shape: f32[1,512], index: 4, kind: output, shape index: {0}]   ;;  %s2275_s5 = inlined_call_operand.vmem [shape: f32[1,128], index: 5, kind: output, shape index: {1}]  }
   0x1   :  { %13 = vsyncpa [#allocation6 + $0x1], 0 }
   0x2   :  { %14 = vsyncpa [#allocation9], 0 }
   0x3   :  { %15 = vsyncpa [#allocation7], 0 }
   0x4   :  { %17 = vsyncpa [#allocation7 + $0x1], 0  ;;  %s1880_s18 = smov 0   ;;  %s1882_s19 = smov 0  }
   0x5   :  { %s1884_s20 = smov 0   ;;  %s1886_s21 = smov 0  }
   0x6 LB: > { %s1901_s22 = sadd.s32 4294967295, %s1833_s21   ;;  %s1161_s23 = sadd.s32 4294967294, %s1833_s21   ;;  %s1833_s21 = sphi %s1886_s21, %s2295_s21   ;;  %s1829_s20 = sphi %s1884_s20, %s2294_s20   ;;  %s1825_s19 = sphi %s1882_s19, %s2293_s19   ;;  %s1821_s18 = sphi %s1880_s18, %s2292_s18  }
   0x7   : > { %p43_p0 = scmp.ne.s32.totalorder %s1825_s19, %s1821_s18  ;;  %p2276_p1 = scmp.eq.s32.totalorder %s1901_s22, 0 }
   0x8   : > { %p136_p3 = scmp.eq.s32.totalorder %s1161_s23, 3  ;;  %p1162_p5 = scmp.ge.s32.totalorder %s1833_s21, 1 }
   0x9   : > { %p1910_p4 = por %p2276_p1, %p43_p0  ;;  %p164_p7 = scmp.lt.s32.totalorder %s1833_s21, 5 }
   0xa   : > { %p1915_p6 = por %p136_p3, %p43_p0  ;;  %s1835_s27 = smov [#allocation8]  }
   0xb   : > { %s2279_s24 = scalar_select %p1910_p4, 1, 0 }
   0xc   : > { %s2280_s25 = scalar_select %p1915_p6, 1, 0 }
   0xd   : > { %p1921_p9 = pnand %p1162_p5, %p164_p7  ;;  %s176_s28 = sshll.u32 %s1835_s27, 4  ;;  %s177_s28 = int_to_ptr.vmem [resolvable:$true] %s176_s28 }
   0xe   : > { %s1836_s30 = smov [#allocation10]   ;;  %s1677_s9 = scalar_lea.hbm %s2271_s1, 4096 }
   0xf   : > { %s2281_s26 = scalar_select %p1921_p9, 1, 0 }
  0x10   : > { %p1506_p10 = pneg %p1921_p9  ;;  %s189_s6 = sshll.u32 %s1836_s30, 4  ;;  %s1933_s6 = int_to_ptr.vmem [resolvable:$true] %s189_s6 }
  0x11   : > { %p1678_p12 = scmp.ne.s32.totalorder %s2271_s1, %s1677_s9  ;;  %p1684_p5 = scmp.lt.u32.totalorder %s1677_s9, %s2271_s1 }
  0x12   : > { %p1929_p11 = pnand %p1506_p10, %p2276_p1 }
  0x14   : > { %p1679_p13 = pneg %p1929_p11 }
  0x16   : > { %p1680_p0 = pnand %p1679_p13, %p1678_p12 }
  0x18   : > { %p1681_p3 = pneg %p1680_p0 }
  0x1a   : > { %p1686_p7 = pnand %p1684_p5, %p1681_p3 }
  0x1c   : > { %1689 = shalt.err (!%p1686_p7)
}
  0x1d   : > { %s1690_s14 = scalar_lea.vmem %s177_s28, 4096  ;;  %p1698_p2 = scmp.lt.s32.totalorder %s177_s28, %s177_s28 }
  0x1e   : > { %p1691_p10 = scmp.ne.s32.totalorder %s177_s28, %s1690_s14  ;;  %p1699_p6 = scmp.lt.s32.totalorder %s1690_s14, %s1690_s14 }
  0x20   : > { %p1693_p8 = pnand %p1691_p10, %p1679_p13  ;;  %p1700_p4 = por %p1699_p6, %p1698_p2 }
  0x22   : > { %p1694_p1 = pneg %p1693_p8 }
  0x24   : > { %p1701_p9 = pnand %p1700_p4, %p1694_p1 }
  0x26   : > { %1704 = shalt.err (!%p1701_p9)
}
  0x27   : > { %s1837_s15 = smov 128   ;;  %s1838_s16 = smov 8  }
  0x28   : > { %1509 = dma.hbm_to_vmem [thread:$0]  (!%p1929_p11), %s2271_s1, 4096, %s177_s28, [#allocation9], %s1837_s15, %s1837_s15, %s1838_s16  }
  0x29   : > { %s1705_s7 = scalar_lea.hbm %s2272_s2, 4096 }
  0x2a   : > { %p1706_p8 = scmp.ne.s32.totalorder %s2272_s2, %s1705_s7  ;;  %p1712_p4 = scmp.lt.u32.totalorder %s1705_s7, %s2272_s2 }
  0x2c   : > { %p1708_p1 = pnand %p1706_p8, %p1679_p13 }
  0x2e   : > { %p1709_p2 = pneg %p1708_p1 }
  0x30   : > { %p1714_p6 = pnand %p1712_p4, %p1709_p2 }
  0x32   : > { %1717 = shalt.err (!%p1714_p6)
}
  0x33   : > { %s1718_s28 = scalar_lea.vmem %s1933_s6, 4096  ;;  %p1726_p3 = scmp.lt.s32.totalorder %s1933_s6, %s1933_s6 }
  0x34   : > { %p1719_p9 = scmp.ne.s32.totalorder %s1933_s6, %s1718_s28  ;;  %p1727_p5 = scmp.lt.s32.totalorder %s1718_s28, %s1718_s28 }
  0x36   : > { %p1721_p12 = pnand %p1719_p9, %p1679_p13  ;;  %p1728_p7 = por %p1727_p5, %p1726_p3 }
  0x38   : > { %p1722_p0 = pneg %p1721_p12 }
  0x3a   : > { %p1729_p10 = pnand %p1728_p7, %p1722_p0 }
  0x3c   : > { %1732 = shalt.err (!%p1729_p10)
}
  0x3d   : > { %s1839_s12 = smov 256   ;;  %s1840_s13 = smov 16  }
  0x3e   : > { %1512 = dma.hbm_to_vmem [thread:$0]  (!%p1929_p11), %s2272_s2, 4096, %s1933_s6, [#allocation9], %s1839_s12, %s1839_s12, %s1840_s13  }
  0x3f   : > { %s1986_s16 = sadd.s32 1, %s1833_s21   ;;  %s30_s23 = sadd.s32 1, %s1829_s20 }
  0x40   : > { %s27_s17 = ssub.s32 %s1833_s21, %s1986_s16  ;;  %p37_p8 = scmp.ne.s32.totalorder %s1829_s20, %s1825_s19 }
  0x41   : > { %p28_p13 = scmp.eq.s32.totalorder %s27_s17, 0  ;;  %p38_p1 = scmp.eq.s32.totalorder %s1833_s21, 0 }
  0x42   : > { %p2283_p4 = scmp.eq.s32.totalorder %s1901_s22, 3  ;;  %p1523_p9 = scmp.lt.s32.totalorder %s1833_s21, 4 }
  0x43   : > { %s1995_s27 = scalar_select %p28_p13, %s1829_s20, %s30_s23  }
  0x44   : > { %p39_p2 = por %p38_p1, %p37_p8  ;;  %p1999_p6 = por %p2283_p4, %p37_p8 }
  0x45   : > { %s206_s30 = sand.u32 1, %s1829_s20   ;;  %s1197_s6 = sshll.u32 %s1833_s21, 12 }
  0x46   : > { %s1166_s7 = sshll.u32 %s206_s30, 8  ;;  %s2009_s10 = scalar_lea.hbm %s2270_s0, %s1197_s6 }
  0x47   : > { %s210_s11 = scalar_lea.vmem [#allocation5], %s1166_s7  ;;  %p2013_p11 = pnand %p1523_p9, %p39_p2 }
  0x48   : > { %s218_s28 = sshll.u32 %s210_s11, 4  ;;  %s2017_s15 = scalar_lea.sflag [#allocation6], %s206_s30  ;;  %s2011_s28 = int_to_ptr.vmem [resolvable:$true] %s218_s28 }
  0x49   : > { %s1733_s17 = scalar_lea.hbm %s2009_s10, 4096  ;;  %p1735_p0 = pneg %p2013_p11 }
  0x4a   : > { %p1734_p12 = scmp.ne.s32.totalorder %s2009_s10, %s1733_s17  ;;  %s1738_s6 = scalar_lea.hbm %s2270_s0, 16384 }
  0x4b   : > { %p1739_p7 = scmp.lt.u32.totalorder %s2009_s10, %s2270_s0  ;;  %p1740_p10 = scmp.lt.u32.totalorder %s1738_s6, %s1733_s17 }
  0x4c   : > { %p1736_p3 = pnand %p1735_p0, %p1734_p12  ;;  %p1742_p8 = scmp.lt.u32.totalorder %s1733_s17, %s2009_s10 }
  0x4d   : > { %p1741_p13 = por %p1740_p10, %p1739_p7 }
  0x4e   : > { %p1737_p5 = pneg %p1736_p3 }
  0x4f   : > { %p1743_p1 = por %p1742_p8, %p1741_p13 }
  0x51   : > { %p1744_p2 = pnand %p1743_p1, %p1737_p5 }
  0x53   : > { %1747 = shalt.err (!%p1744_p2)
}
  0x54   : > { %s1748_s30 = scalar_lea.vmem %s2011_s28, 4096  ;;  %s1841_s11 = smov [#allocation5]  }
  0x55   : > { %p1749_p4 = scmp.ne.s32.totalorder %s2011_s28, %s1748_s30  ;;  %s1753_s23 = sshll.u32 %s1841_s11, 4  ;;  %s1754_s23 = int_to_ptr.vmem [resolvable:$false] %s1753_s23 }
  0x56   : > { %s1755_s7 = scalar_lea.vmem %s1754_s23, 8192  ;;  %p1756_p3 = scmp.lt.s32.totalorder %s2011_s28, %s1754_s23 }
  0x57   : > { %p1751_p9 = pnand %p1749_p4, %p1735_p0  ;;  %p1757_p7 = scmp.lt.s32.totalorder %s1755_s7, %s1748_s30 }
  0x59   : > { %p1752_p12 = pneg %p1751_p9  ;;  %p1758_p10 = por %p1757_p7, %p1756_p3 }
  0x5b   : > { %p1759_p13 = pnand %p1758_p10, %p1752_p12 }
  0x5d   : > { %1762 = shalt.err (!%p1759_p13)
}
  0x5e   : > { %1516 = dma.hbm_to_vmem [thread:$0]  (!%p2013_p11), %s2009_s10, 4096, %s2011_s28, %s2017_s15, %s1839_s12, %s1839_s12, %s1840_s13  }
  0x5f   : > { %p2286_p0 = scmp.ne.s32.totalorder %s2281_s26, 0 }
  0x60   : > { %s2051_s17 = sand.u32 (!%p2286_p0), 1, %s1825_s19   ;;  %p2287_p5 = scmp.ne.s32.totalorder (!%p2286_p0), %s2279_s24, 0 }
  0x61   : > { %230 = sbr.rel (%p2286_p0) target bundleno = 1509 (0x5e5), region = 36  ;;  %s1171_s6 = sshll.u32 (!%p2286_p0), %s2051_s17, 8 }
  0x62   : > { %s233_s8 = scalar_lea.sflag (!%p2286_p0), [#allocation6], %s2051_s17  ;;  %s2055_s9 = scalar_lea.vmem (!%p2286_p0), [#allocation5], %s1171_s6 }
  0x68   : > { %1808 = dma.done.wait (%p2287_p5), %s233_s8, 4096  }
  0x69   : > { %1810 = vsyncadd (%p2287_p5), %s233_s8, 4294963200  ;;  %p2288_p11 = scmp.eq.s32.totalorder %s1901_s22, 0 }
  0x6b   : > { %1812 = dma.done.wait (%p2288_p11), [#allocation9], 8192   ;;  %p2289_p8 = pmov %p2288_p11 }
  0x6c   : > { %v2068_v0 = vld [vmem:[%s2273_s3] ss:$0 sm:$0xff]  ;;  %v2073_v1 = vld [vmem:[%s2273_s3 + $0x1] sm:$0x3]  ;;  %v2078_v2 = vld [vmem:[%s2273_s3 + $0x3] sm:$0x1] }
  0x6d   : > { %1814 = vsyncadd (%p2289_p8), [#allocation9], 4294959104  ;;  %v2083_v3 = vld [vmem:[%s2273_s3 + $0x4] sm:$0x1]  ;;  %s267_s30 = scalar_lea.vmem [#allocation11], %s2051_s17  ;;  %p2290_p1 = scmp.ne.s32.totalorder %s1901_s22, 0 }
  0x6e   : > { %vm279_vm0 = vcmask (!%p2290_p1), 0   ;;  %v1842_v4 = vmov (!%p2290_p1), -inf   ;;  %v1843_v5 = vmov (!%p2290_p1), 0.0  }
  0x6f   : > { %278 = sbr.rel (%p2290_p1) target bundleno = 118 (0x76), region = 52  ;;  %280 = vst.msk [vmem:[#allocation2] sm:$0x1] (!%p2290_p1), %vm279_vm0, %v1842_v4  ;;  %281 = vst.msk [vmem:[#allocation3] sm:$0x1] (!%p2290_p1), %vm279_vm0, %v1843_v5 }
  0x70   : > { %282 = vst [vmem:[#allocation4] sm:$0x1] (!%p2290_p1), %v1843_v5 }
  0x76 PF: > { %v331_v6 = vld [vmem:[#allocation8 + $0x80] sm:$0xff]  ;;  %v332_v7 = vld [vmem:[#allocation8 + $0x88] sm:$0xff]  ;;  %v333_v11 = vld [vmem:[#allocation8 + $0x90] sm:$0xff]  ;;  %vm1846_vm1 = vmmov 0   ;;  %vm927_vm2 = vcmask 1040384   ;;  %vm953_vm3 = vcmask 0  }
  0x77   : > { %v315_v8 = vld [vmem:[#allocation8] sm:$0xff]  ;;  %v1382_v9 = vpack.c.bf16 %v332_v7, %v331_v6  ;;  %v316_v10 = vld [vmem:[#allocation8 + $0x8] sm:$0xff]  ;;  %v334_v12 = vld [vmem:[#allocation8 + $0x98] sm:$0xff]  ;;  %p1192_p2 = scmp.ne.s32.totalorder %s1901_s22, 3 }
  0x78   : > { %v1384_v13 = vpack.c.bf16 %v316_v10, %v315_v8  ;;  %v1386_v14 = vpack.c.bf16 %v334_v12, %v333_v11  ;;  %v317_v15 = vld [vmem:[#allocation8 + $0x10] sm:$0xff]  ;;  %v318_v16 = vld [vmem:[#allocation8 + $0x18] sm:$0xff]  ;;  %v335_v17 = vld [vmem:[#allocation8 + $0xa0] sm:$0xff] }
  0x79   : > { %1383 = vmatprep.subr.bf16.mxu0 %v1382_v9  ;;  %v336_v18 = vld [vmem:[#allocation8 + $0xa8] sm:$0xff]  ;;  %v1388_v19 = vpack.c.bf16 %v318_v16, %v317_v15  ;;  %v319_v21 = vld [vmem:[#allocation8 + $0x20] sm:$0xff]  ;;  %v337_v23 = vld [vmem:[#allocation8 + $0xb0] sm:$0xff] }
  0x7a   : > { %1385 = vmatpush3.bf16.msra.mxu0 %v1384_v13  ;;  %v1390_v20 = vpack.c.bf16 %v336_v18, %v335_v17  ;;  %v320_v22 = vld [vmem:[#allocation8 + $0x28] sm:$0xff]  ;;  %v338_v24 = vld [vmem:[#allocation8 + $0xb8] sm:$0xff]  ;;  %v321_v27 = vld [vmem:[#allocation8 + $0x30] sm:$0xff] }
  0x7b   : > { %1387 = vmatprep.subr.bf16.mxu0 %v1386_v14  ;;  %v1392_v25 = vpack.c.bf16 %v320_v22, %v319_v21  ;;  %v1394_v26 = vpack.c.bf16 %v338_v24, %v337_v23  ;;  %v322_v28 = vld [vmem:[#allocation8 + $0x38] sm:$0xff]  ;;  %v339_v29 = vld [vmem:[#allocation8 + $0xc0] sm:$0xff]  ;;  %v340_v30 = vld [vmem:[#allocation8 + $0xc8] sm:$0xff] }
  0x7c   : > { %v284_v31 = vld [vmem:[%s2055_s9 + $0x8] sm:$0xff]  ;;  %v1396_v32 = vpack.c.bf16 %v322_v28, %v321_v27  ;;  %v1398_v33 = vpack.c.bf16 %v340_v30, %v339_v29  ;;  %v323_v34 = vld [vmem:[#allocation8 + $0x40] sm:$0xff]  ;;  %v341_v36 = vld [vmem:[#allocation8 + $0xd0] sm:$0xff] }
  0x7d   : > { %417 = vmatprep.mubr.f32.mxu0 %v284_v31  ;;  %v324_v35 = vld [vmem:[#allocation8 + $0x48] sm:$0xff]  ;;  %v342_v37 = vld [vmem:[#allocation8 + $0xd8] sm:$0xff]  ;;  %v325_v40 = vld [vmem:[#allocation8 + $0x50] sm:$0xff] }
  0x7e   : > { %1389 = vmatpush3.bf16.msra.mxu0 %v1388_v19  ;;  %v1400_v38 = vpack.c.bf16 %v324_v35, %v323_v34  ;;  %v1402_v39 = vpack.c.bf16 %v342_v37, %v341_v36  ;;  %v326_v41 = vld [vmem:[#allocation8 + $0x58] sm:$0xff]  ;;  %v343_v42 = vld [vmem:[#allocation8 + $0xe0] sm:$0xff]  ;;  %v344_v43 = vld [vmem:[#allocation8 + $0xe8] sm:$0xff] }
  0x7f   : > { %1391 = vmatprep.subr.bf16.mxu0 %v1390_v20  ;;  %v1404_v44 = vpack.c.bf16 %v326_v41, %v325_v40  ;;  %v327_v45 = vld [vmem:[#allocation8 + $0x60] sm:$0xff]  ;;  %v328_v46 = vld [vmem:[#allocation8 + $0x68] sm:$0xff]  ;;  %v345_v47 = vld [vmem:[#allocation8 + $0xf0] sm:$0xff]  ;;  %v1406_v48 = vpack.c.bf16 %v344_v43, %v343_v42 }
  0x80   : > { %v346_v49 = vld [vmem:[#allocation8 + $0xf8] sm:$0xff]  ;;  %v515_v50 = vld [vmem:[#allocation10 + $0x8] sm:$0xff]  ;;  %v514_v53 = vld [vmem:[#allocation10] sm:$0xff]  ;;  %v1408_v60 = vpack.c.bf16 %v328_v46, %v327_v45 }
  0x81   : > { %v517_v51 = vld [vmem:[#allocation10 + $0x18] sm:$0xff]  ;;  %v516_v54 = vld [vmem:[#allocation10 + $0x10] sm:$0xff]  ;;  %v519_v55 = vld [vmem:[#allocation10 + $0x28] sm:$0xff]  ;;  %v1410_v4 = vpack.c.bf16 %v346_v49, %v345_v47 }
  0x82   : > { %1393 = vmatpush3.bf16.msra.mxu0 %v1392_v25  ;;  %v1414_v52 = vpack.c.bf16 %v517_v51, %v515_v50  ;;  %v1416_v56 = vpack.c.bf16 %v516_v54, %v514_v53  ;;  %v521_v57 = vld [vmem:[#allocation10 + $0x38] sm:$0xff]  ;;  %v518_v58 = vld [vmem:[#allocation10 + $0x20] sm:$0xff]  ;;  %v520_v59 = vld [vmem:[#allocation10 + $0x30] sm:$0xff] }
  0x83   : > { %1395 = vmatprep.subr.bf16.mxu0 %v1394_v26  ;;  %v1418_v61 = vpack.c.bf16 %v521_v57, %v519_v55  ;;  %v523_v62 = vld [vmem:[#allocation10 + $0x48] sm:$0xff]  ;;  %v525_v63 = vld [vmem:[#allocation10 + $0x58] sm:$0xff]  ;;  %v329_v5 = vld [vmem:[#allocation8 + $0x70] sm:$0xff]  ;;  %v1420_v7 = vpack.c.bf16 %v520_v59, %v518_v58 }
  0x84   : > { %1415 = vmatprep.subr.bf16.mxu1 %v1414_v52  ;;  %v330_v6 = vld [vmem:[#allocation8 + $0x78] sm:$0xff]  ;;  %v1422_v8 = vpack.c.bf16 %v525_v63, %v523_v62  ;;  %v522_v9 = vld [vmem:[#allocation10 + $0x40] sm:$0xff]  ;;  %v524_v10 = vld [vmem:[#allocation10 + $0x50] sm:$0xff] }
  0x85   : > { %1417 = vmatpush1.bf16.msra.mxu1 %v1416_v56  ;;  %v527_v11 = vld [vmem:[#allocation10 + $0x68] sm:$0xff]  ;;  %v529_v12 = vld [vmem:[#allocation10 + $0x78] sm:$0xff]  ;;  %v1412_v13 = vpack.c.bf16 %v330_v6, %v329_v5  ;;  %v1424_v14 = vpack.c.bf16 %v524_v10, %v522_v9  ;;  %v526_v16 = vld [vmem:[#allocation10 + $0x60] sm:$0xff] }
  0x86   : > { %1397 = vmatpush3.bf16.msra.mxu0 %v1396_v32  ;;  %1419 = vmatprep.subr.bf16.mxu1 %v1418_v61  ;;  %v1426_v15 = vpack.c.bf16 %v529_v12, %v527_v11  ;;  %v528_v17 = vld [vmem:[#allocation10 + $0x70] sm:$0xff]  ;;  %v531_v18 = vld [vmem:[#allocation10 + $0x88] sm:$0xff]  ;;  %v533_v19 = vld [vmem:[#allocation10 + $0x98] sm:$0xff] }
  0x87   : > { %1399 = vmatprep.subr.bf16.mxu0 %v1398_v33  ;;  %v283_v20 = vld [vmem:[%s2055_s9] sm:$0xff]  ;;  %v286_v21 = vld [vmem:[%s2055_s9 + $0x18] sm:$0xff]  ;;  %v1428_v22 = vpack.c.bf16 %v528_v17, %v526_v16  ;;  %v1430_v23 = vpack.c.bf16 %v533_v19, %v531_v18  ;;  %v532_v25 = vld [vmem:[#allocation10 + $0x90] sm:$0xff] }
  0x88   : > { %v530_v24 = vld [vmem:[#allocation10 + $0x80] sm:$0xff]  ;;  %v535_v26 = vld [vmem:[#allocation10 + $0xa8] sm:$0xff]  ;;  %v537_v27 = vld [vmem:[#allocation10 + $0xb8] sm:$0xff] }
  0x89   : > { %1421 = vmatpush1.bf16.msra.mxu1 %v1420_v7  ;;  %v285_v28 = vld [vmem:[%s2055_s9 + $0x10] sm:$0xff]  ;;  %v288_v29 = vld [vmem:[%s2055_s9 + $0x28] sm:$0xff]  ;;  %v1432_v30 = vpack.c.bf16 %v532_v25, %v530_v24  ;;  %v1434_v31 = vpack.c.bf16 %v537_v27, %v535_v26  ;;  %v534_v32 = vld [vmem:[#allocation10 + $0xa0] sm:$0xff] }
  0x8a   : > { %1401 = vmatpush3.bf16.msra.mxu0 %v1400_v38  ;;  %1423 = vmatprep.subr.bf16.mxu1 %v1422_v8  ;;  %v536_v33 = vld [vmem:[#allocation10 + $0xb0] sm:$0xff]  ;;  %v287_v34 = vld [vmem:[%s2055_s9 + $0x20] sm:$0xff]  ;;  %v290_v35 = vld [vmem:[%s2055_s9 + $0x38] sm:$0xff] }
  0x8b   : > { %1403 = vmatprep.subr.bf16.mxu0 %v1402_v39  ;;  %v1436_v36 = vpack.c.bf16 %v536_v33, %v534_v32  ;;  %v289_v37 = vld [vmem:[%s2055_s9 + $0x30] sm:$0xff]  ;;  %v292_v38 = vld [vmem:[%s2055_s9 + $0x48] sm:$0xff]  ;;  %v291_v39 = vld [vmem:[%s2055_s9 + $0x40] sm:$0xff] }
  0x8c   : > { %v294_v40 = vld [vmem:[%s2055_s9 + $0x58] sm:$0xff]  ;;  %v293_v41 = vld [vmem:[%s2055_s9 + $0x50] sm:$0xff]  ;;  %v296_v42 = vld [vmem:[%s2055_s9 + $0x68] sm:$0xff] }
  0x8d   : > { %1425 = vmatpush1.bf16.msra.mxu1 %v1424_v14  ;;  %v295_v43 = vld [vmem:[%s2055_s9 + $0x60] sm:$0xff]  ;;  %v297_v45 = vld [vmem:[%s2055_s9 + $0x70] sm:$0xff]  ;;  %v300_v46 = vld [vmem:[%s2055_s9 + $0x88] sm:$0xff]  ;;  %v1844_v14 = vmov 0.0  }
  0x8e   : > { %1405 = vmatpush3.bf16.msra.mxu0 %v1404_v44  ;;  %1427 = vmatprep.subr.bf16.mxu1 %v1426_v15  ;;  %v298_v44 = vld [vmem:[%s2055_s9 + $0x78] sm:$0xff]  ;;  %v299_v47 = vld [vmem:[%s2055_s9 + $0x80] sm:$0xff]  ;;  %v301_v49 = vld [vmem:[%s2055_s9 + $0x90] sm:$0xff]  ;;  %v1845_v15 = vmov 0.0|0.0  }
  0x8f   : > { %1407 = vmatprep.subr.bf16.mxu0 %v1406_v48  ;;  %v302_v48 = vld [vmem:[%s2055_s9 + $0x98] sm:$0xff]  ;;  %v304_v50 = vld [vmem:[%s2055_s9 + $0xa8] sm:$0xff]  ;;  %v303_v51 = vld [vmem:[%s2055_s9 + $0xa0] sm:$0xff]  ;;  %621 = vmatprep.mubr.f32.mxu1 %v1844_v14 }
  0x90   : > { %v306_v52 = vld [vmem:[%s2055_s9 + $0xb8] sm:$0xff]  ;;  %v305_v53 = vld [vmem:[%s2055_s9 + $0xb0] sm:$0xff]  ;;  %v308_v54 = vld [vmem:[%s2055_s9 + $0xc8] sm:$0xff] }
  0x91   : > { %1429 = vmatpush1.bf16.msra.mxu1 %v1428_v22  ;;  %v307_v55 = vld [vmem:[%s2055_s9 + $0xc0] sm:$0xff]  ;;  %v310_v56 = vld [vmem:[%s2055_s9 + $0xd8] sm:$0xff]  ;;  %v309_v57 = vld [vmem:[%s2055_s9 + $0xd0] sm:$0xff] }
  0x92   : > { %1409 = vmatpush3.bf16.msra.mxu0 %v1408_v60  ;;  %1431 = vmatprep.subr.bf16.mxu1 %v1430_v23  ;;  %v312_v58 = vld [vmem:[%s2055_s9 + $0xe8] sm:$0xff]  ;;  %v311_v59 = vld [vmem:[%s2055_s9 + $0xe0] sm:$0xff]  ;;  %v314_v60 = vld [vmem:[%s2055_s9 + $0xf8] sm:$0xff] }
  0x93   : > { %1411 = vmatprep.subr.bf16.mxu0 %v1410_v4  ;;  %v313_v61 = vld [vmem:[%s2055_s9 + $0xf0] sm:$0xff]  ;;  %v539_v62 = vld [vmem:[#allocation10 + $0xc8] sm:$0xff]  ;;  %v541_v63 = vld [vmem:[#allocation10 + $0xd8] sm:$0xff] }
  0x94   : > { %v1438_v4 = vpack.c.bf16 %v541_v63, %v539_v62  ;;  %v538_v5 = vld [vmem:[#allocation10 + $0xc0] sm:$0xff]  ;;  %v540_v6 = vld [vmem:[#allocation10 + $0xd0] sm:$0xff]  ;;  %v543_v8 = vld [vmem:[#allocation10 + $0xe8] sm:$0xff] }
  0x95   : > { %1433 = vmatpush1.bf16.msra.mxu1 %v1432_v30  ;;  %v1440_v7 = vpack.c.bf16 %v540_v6, %v538_v5  ;;  %v545_v9 = vld [vmem:[#allocation10 + $0xf8] sm:$0xff]  ;;  %v542_v11 = vld [vmem:[#allocation10 + $0xe0] sm:$0xff]  ;;  %v544_v12 = vld [vmem:[#allocation10 + $0xf0] sm:$0xff] }
  0x96   : > { %1413 = vmatpush3.bf16.msra.mxu0 %v1412_v13  ;;  %1435 = vmatprep.subr.bf16.mxu1 %v1434_v31  ;;  %v1442_v10 = vpack.c.bf16 %v545_v9, %v543_v8  ;;  %v1444_v13 = vpack.c.bf16 %v544_v12, %v542_v11 }
  0x97   : > { %1446 = vmatprep.subr.bf16.mxu0 %v1845_v15 }
  0x99   : > { %418 = vmatmul.mubr.f32.vlgmr.msra.gmra.mrb[0].mxu0 %v283_v20  ;;  %1437 = vmatpush1.bf16.msra.mxu1 %v1436_v36 }
  0x9a   : > { %422 = vmatprep.mubr.f32.mxu0 %v286_v21  ;;  %1439 = vmatprep.subr.bf16.mxu1 %v1438_v4 }
  0x9d   : > { %423 = vmatmul.mubr.f32.gmra.mrb[2].mxu0 %v285_v28  ;;  %1441 = vmatpush1.bf16.msra.mxu1 %v1440_v7 }
  0x9e   : > { %427 = vmatprep.mubr.f32.mxu0 %v288_v29  ;;  %1443 = vmatprep.subr.bf16.mxu1 %v1442_v10 }
  0xa1   : > { %428 = vmatmul.mubr.f32.gmra.mrb[4].mxu0 %v287_v34  ;;  %1445 = vmatpush1.bf16.msra.mxu1 %v1444_v13 }
  0xa2   : > { %432 = vmatprep.mubr.f32.mxu0 %v290_v35  ;;  %1470 = vmatprep.subr.bf16.mxu1 %v1845_v15 }
  0xa5   : > { %433 = vmatmul.mubr.f32.gmra.mrb[6].mxu0 %v289_v37 }
  0xa6   : > { %437 = vmatprep.mubr.f32.mxu0 %v292_v38 }
  0xa9   : > { %438 = vmatmul.mubr.f32.gmra.mrb[8].mxu0 %v291_v39 }
  0xaa   : > { %442 = vmatprep.mubr.f32.mxu0 %v294_v40 }
  0xad   : > { %443 = vmatmul.mubr.f32.gmra.mrb[10].mxu0 %v293_v41 }
  0xae   : > { %447 = vmatprep.mubr.f32.mxu0 %v296_v42 }
  0xb1   : > { %448 = vmatmul.mubr.f32.gmra.mrb[12].mxu0 %v295_v43 }
  0xb2   : > { %452 = vmatprep.mubr.f32.mxu0 %v298_v44 }
  0xb5   : > { %453 = vmatmul.mubr.f32.gmra.mrb[14].mxu0 %v297_v45 }
  0xb6   : > { %457 = vmatprep.mubr.f32.mxu0 %v300_v46 }
  0xb9   : > { %458 = vmatmul.mubr.f32.gmra.mrb[16].mxu0 %v299_v47 }
  0xba   : > { %462 = vmatprep.mubr.f32.mxu0 %v302_v48 }
  0xbd   : > { %463 = vmatmul.mubr.f32.gmra.mrb[18].mxu0 %v301_v49 }
  0xbe   : > { %467 = vmatprep.mubr.f32.mxu0 %v304_v50 }
  0xc1   : > { %468 = vmatmul.mubr.f32.gmra.mrb[20].mxu0 %v303_v51 }
  0xc2   : > { %472 = vmatprep.mubr.f32.mxu0 %v306_v52 }
  0xc5   : > { %473 = vmatmul.mubr.f32.gmra.mrb[22].mxu0 %v305_v53 }
  0xc6   : > { %477 = vmatprep.mubr.f32.mxu0 %v308_v54 }
  0xc9   : > { %478 = vmatmul.mubr.f32.gmra.mrb[24].mxu0 %v307_v55 }
  0xca   : > { %482 = vmatprep.mubr.f32.mxu0 %v310_v56 }
  0xcd   : > { %483 = vmatmul.mubr.f32.gmra.mrb[26].mxu0 %v309_v57 }
  0xce   : > { %487 = vmatprep.mubr.f32.mxu0 %v312_v58 }
  0xd1   : > { %488 = vmatmul.mubr.f32.gmra.mrb[28].mxu0 %v311_v59 }
  0xd2   : > { %492 = vmatprep.mubr.f32.mxu0 %v314_v60 }
  0xd5   : > { %493 = vmatmul.mubr.f32.gmra.mrb[30].mxu0 %v313_v61 }
  0xd6   : > { %1344 = vmatprep.mubr.msk.f32.mxu0 %vm1846_vm1, %v1844_v14 }
 0x16c   : > { %v1230_v16 = vpop.f32.mrb[0].mxu0 }
 0x16d   : > { %v1231_v17 = vpop.f32.mrb[1].mxu0 }
 0x16e   : > { %v1232_v18 = vadd.f32 %v1231_v17, %v1230_v16 }
 0x170   : > { %v420_v19 = vadd.f32 %v1232_v18, %v2068_v0  ;;  %v1233_v20 = vpop.f32.mrb[2].mxu0 }
 0x171   : > { %v1234_v21 = vpop.f32.mrb[3].mxu0 }
 0x172   : > { %v498_v22 = vmax.f32 %v420_v19, 0.0  ;;  %v1235_v23 = vadd.f32 %v1234_v21, %v1233_v20 }
 0x174   : > { %v425_v24 = vadd.f32 %v1235_v23, %v2068_v0  ;;  %v1236_v25 = vpop.f32.mrb[4].mxu0  ;;  %622 = vmatmul.mubr.f32.vlgmr.msra.gmra.mrb[0].mxu1 %v498_v22 }
 0x175   : > { %v1237_v26 = vpop.f32.mrb[5].mxu0  ;;  %627 = vmatprep.mubr.f32.mxu1 %v1844_v14 }
 0x176   : > { %v499_v27 = vmax.f32 %v425_v24, 0.0  ;;  %v1238_v28 = vadd.f32 %v1237_v26, %v1236_v25 }
 0x178   : > { %v1471_v29 = vpack.c.bf16 %v499_v27, %v498_v22  ;;  %v430_v30 = vadd.f32 %v1238_v28, %v2068_v0  ;;  %v1239_v31 = vpop.f32.mrb[6].mxu0  ;;  %628 = vmatmul.mubr.f32.gmra.mrb[2].mxu1 %v499_v27 }
 0x179   : > { %v1240_v32 = vpop.f32.mrb[7].mxu0  ;;  %633 = vmatprep.mubr.f32.mxu1 %v1844_v14 }
 0x17a   : > { %v500_v33 = vmax.f32 %v430_v30, 0.0  ;;  %v1241_v34 = vadd.f32 %v1240_v32, %v1239_v31  ;;  %1472 = vmatpush3.bf16.msra.mxu1 %v1471_v29 }
 0x17b   : > { %1473 = vmatprep.subr.bf16.mxu1 %v1845_v15 }
 0x17c   : > { %v435_v35 = vadd.f32 %v1241_v34, %v2068_v0  ;;  %v1242_v36 = vpop.f32.mrb[8].mxu0  ;;  %634 = vmatmul.mubr.f32.gmra.mrb[4].mxu1 %v500_v33 }
 0x17d   : > { %v1243_v37 = vpop.f32.mrb[9].mxu0  ;;  %639 = vmatprep.mubr.f32.mxu1 %v1844_v14 }
 0x17e   : > { %v501_v38 = vmax.f32 %v435_v35, 0.0  ;;  %v1244_v39 = vadd.f32 %v1243_v37, %v1242_v36 }
 0x180   : > { %v1474_v40 = vpack.c.bf16 %v501_v38, %v500_v33  ;;  %v440_v41 = vadd.f32 %v1244_v39, %v2068_v0  ;;  %v1245_v42 = vpop.f32.mrb[10].mxu0  ;;  %640 = vmatmul.mubr.f32.gmra.mrb[6].mxu1 %v501_v38 }
 0x181   : > { %v1246_v43 = vpop.f32.mrb[11].mxu0  ;;  %645 = vmatprep.mubr.f32.mxu1 %v1844_v14 }
 0x182   : > { %v502_v44 = vmax.f32 %v440_v41, 0.0  ;;  %v1247_v45 = vadd.f32 %v1246_v43, %v1245_v42  ;;  %1475 = vmatpush3.bf16.msra.mxu1 %v1474_v40 }
 0x183   : > { %1476 = vmatprep.subr.bf16.mxu1 %v1845_v15 }
 0x184   : > { %v445_v46 = vadd.f32 %v1247_v45, %v2068_v0  ;;  %v1248_v47 = vpop.f32.mrb[12].mxu0  ;;  %646 = vmatmul.mubr.f32.gmra.mrb[8].mxu1 %v502_v44 }
 0x185   : > { %v1249_v48 = vpop.f32.mrb[13].mxu0  ;;  %651 = vmatprep.mubr.f32.mxu1 %v1844_v14 }
 0x186   : > { %v503_v49 = vmax.f32 %v445_v46, 0.0  ;;  %v1250_v50 = vadd.f32 %v1249_v48, %v1248_v47  ;;  %v1847_v46 = vmov 0   ;;  %v547_v47 = vlaneseq }
 0x187   : > { %1572 = vset.pattern.permute.xlu0 %v1847_v46  ;;  %1573 = vset.pattern.permute.xlu1 %v1847_v46 }
 0x188   : > { %v1477_v51 = vpack.c.bf16 %v503_v49, %v502_v44  ;;  %v450_v52 = vadd.f32 %v1250_v50, %v2068_v0  ;;  %v1251_v53 = vpop.f32.mrb[14].mxu0  ;;  %652 = vmatmul.mubr.f32.gmra.mrb[10].mxu1 %v503_v49  ;;  %848 = vperm.xlu0 %1572, %v2083_v3   ;;  %v548_v48 = vshrl.u32 %v547_v47, 7 }
 0x189   : > { %v1252_v54 = vpop.f32.mrb[15].mxu0  ;;  %657 = vmatprep.mubr.f32.mxu1 %v1844_v14 }
 0x18a   : > { %v504_v55 = vmax.f32 %v450_v52, 0.0  ;;  %v1253_v56 = vadd.f32 %v1252_v54, %v1251_v53  ;;  %1478 = vmatpush3.bf16.msra.mxu1 %v1477_v51 }
 0x18b   : > { %1479 = vmatprep.subr.bf16.mxu1 %v1845_v15 }
 0x18c   : > { %v455_v57 = vadd.f32 %v1253_v56, %v2068_v0  ;;  %v1254_v58 = vpop.f32.mrb[16].mxu0  ;;  %658 = vmatmul.mubr.f32.gmra.mrb[12].mxu1 %v504_v55 }
 0x18d   : > { %v1255_v59 = vpop.f32.mrb[17].mxu0  ;;  %663 = vmatprep.mubr.f32.mxu1 %v1844_v14 }
 0x18e   : > { %v505_v60 = vmax.f32 %v455_v57, 0.0  ;;  %v1256_v61 = vadd.f32 %v1255_v59, %v1254_v58 }
 0x190   : > { %v1480_v62 = vpack.c.bf16 %v505_v60, %v504_v55  ;;  %v460_v63 = vadd.f32 %v1256_v61, %v2068_v0  ;;  %v1257_v4 = vpop.f32.mrb[18].mxu0  ;;  %664 = vmatmul.mubr.f32.gmra.mrb[14].mxu1 %v505_v60  ;;  %v2168_v55 = vsub.s32 0, %v548_v48 }
 0x191   : > { %v1258_v5 = vpop.f32.mrb[19].mxu0  ;;  %669 = vmatprep.mubr.f32.mxu1 %v1844_v14 }
 0x192   : > { %v506_v6 = vmax.f32 %v460_v63, 0.0  ;;  %v1259_v7 = vadd.f32 %v1258_v5, %v1257_v4  ;;  %1481 = vmatpush3.bf16.msra.mxu1 %v1480_v62  ;;  %v2173_v58 = vrot.slane %v2073_v1, %v2168_v55 }
 0x193   : > { %1482 = vmatprep.subr.bf16.mxu1 %v1845_v15 }
 0x194   : > { %v465_v8 = vadd.f32 %v1259_v7, %v2068_v0  ;;  %v1260_v9 = vpop.f32.mrb[20].mxu0  ;;  %670 = vmatmul.mubr.f32.gmra.mrb[16].mxu1 %v506_v6 }
 0x195   : > { %v1261_v10 = vpop.f32.mrb[21].mxu0  ;;  %675 = vmatprep.mubr.f32.mxu1 %v1844_v14 }
 0x196   : > { %v507_v11 = vmax.f32 %v465_v8, 0.0  ;;  %v1262_v12 = vadd.f32 %v1261_v10, %v1260_v9 }
 0x198   : > { %v1483_v13 = vpack.c.bf16 %v507_v11, %v506_v6  ;;  %v470_v16 = vadd.f32 %v1262_v12, %v2068_v0  ;;  %v1263_v17 = vpop.f32.mrb[22].mxu0  ;;  %676 = vmatmul.mubr.f32.gmra.mrb[18].mxu1 %v507_v11 }
 0x199   : > { %v1264_v18 = vpop.f32.mrb[23].mxu0  ;;  %681 = vmatprep.mubr.f32.mxu1 %v1844_v14 }
 0x19a   : > { %v508_v19 = vmax.f32 %v470_v16, 0.0  ;;  %v1265_v20 = vadd.f32 %v1264_v18, %v1263_v17  ;;  %1484 = vmatpush3.bf16.msra.mxu1 %v1483_v13 }
 0x19b   : > { %1485 = vmatprep.subr.bf16.mxu1 %v1845_v15 }
 0x19c   : > { %v475_v21 = vadd.f32 %v1265_v20, %v2068_v0  ;;  %v1266_v22 = vpop.f32.mrb[24].mxu0  ;;  %682 = vmatmul.mubr.f32.gmra.mrb[20].mxu1 %v508_v19 }
 0x19d   : > { %v1267_v23 = vpop.f32.mrb[25].mxu0  ;;  %687 = vmatprep.mubr.f32.mxu1 %v1844_v14 }
 0x19e   : > { %v509_v24 = vmax.f32 %v475_v21, 0.0  ;;  %v1268_v25 = vadd.f32 %v1267_v23, %v1266_v22 }
 0x1a0   : > { %v1486_v26 = vpack.c.bf16 %v509_v24, %v508_v19  ;;  %v480_v27 = vadd.f32 %v1268_v25, %v2068_v0  ;;  %v1269_v28 = vpop.f32.mrb[26].mxu0  ;;  %688 = vmatmul.mubr.f32.gmra.mrb[22].mxu1 %v509_v24 }
 0x1a1   : > { %v1270_v29 = vpop.f32.mrb[27].mxu0  ;;  %693 = vmatprep.mubr.f32.mxu1 %v1844_v14 }
 0x1a2   : > { %v510_v30 = vmax.f32 %v480_v27, 0.0  ;;  %v1271_v31 = vadd.f32 %v1270_v29, %v1269_v28  ;;  %1487 = vmatpush3.bf16.msra.mxu1 %v1486_v26 }
 0x1a3   : > { %1488 = vmatprep.subr.bf16.mxu1 %v1845_v15 }
 0x1a4   : > { %v485_v32 = vadd.f32 %v1271_v31, %v2068_v0  ;;  %v1272_v33 = vpop.f32.mrb[28].mxu0  ;;  %694 = vmatmul.mubr.f32.gmra.mrb[24].mxu1 %v510_v30 }
 0x1a5   : > { %v1273_v34 = vpop.f32.mrb[29].mxu0  ;;  %699 = vmatprep.mubr.f32.mxu1 %v1844_v14 }
 0x1a6   : > { %v511_v35 = vmax.f32 %v485_v32, 0.0  ;;  %v1274_v36 = vadd.f32 %v1273_v34, %v1272_v33 }
 0x1a8   : > { %v1489_v37 = vpack.c.bf16 %v511_v35, %v510_v30  ;;  %v490_v38 = vadd.f32 %v1274_v36, %v2068_v0  ;;  %v1275_v39 = vpop.f32.mrb[30].mxu0  ;;  %700 = vmatmul.mubr.f32.gmra.mrb[26].mxu1 %v511_v35 }
 0x1a9   : > { %v1276_v40 = vpop.f32.mrb[31].mxu0  ;;  %705 = vmatprep.mubr.f32.mxu1 %v1844_v14 }
 0x1aa   : > { %v512_v41 = vmax.f32 %v490_v38, 0.0  ;;  %v1277_v42 = vadd.f32 %v1276_v40, %v1275_v39  ;;  %1490 = vmatpush3.bf16.msra.mxu1 %v1489_v37 }
 0x1ab   : > { %1491 = vmatprep.subr.bf16.mxu1 %v1845_v15 }
 0x1ac   : > { %v495_v43 = vadd.f32 %v1277_v42, %v2068_v0  ;;  %706 = vmatmul.mubr.f32.gmra.mrb[28].mxu1 %v512_v41  ;;  %v553_v0 = vsub.s32 1, %v548_v48 }
 0x1ad   : > { %711 = vmatprep.mubr.f32.mxu1 %v1844_v14 }
 0x1ae   : > { %v513_v44 = vmax.f32 %v495_v43, 0.0  ;;  %v2165_v49 = vrot.slane %v2073_v1, %v553_v0 }
 0x1b0   : > { %v1492_v45 = vpack.c.bf16 %v513_v44, %v512_v41  ;;  %712 = vmatmul.mubr.f32.gmra.mrb[30].mxu1 %v513_v44 }
 0x1b1   : > { %1379 = vmatprep.mubr.msk.f32.mxu1 %vm1846_vm1, %v1844_v14 }
 0x1b2   : > { %1493 = vmatpush3.bf16.msra.mxu1 %v1492_v45 }
 0x247   : > { %v623_v50 = vpop.f32.mrb[0].mxu1 }
 0x248   : > { %v625_v51 = vpop.f32.mrb[1].mxu1  ;;  %v624_v63 = vadd.f32 %v623_v50, %v2173_v58 }
 0x249   : > { %v626_v52 = vadd.f32 %v625_v51, %v2165_v49 }
 0x24b   : > { %v1176_v53 = vmul.f32 -1.442695, %v626_v52  ;;  %v629_v54 = vpop.f32.mrb[2].mxu1 }
 0x24c   : > { %v631_v14 = vpop.f32.mrb[3].mxu1  ;;  %v630_v1 = vadd.f32 %v629_v54, %v2173_v58 }
 0x24d   : > { %1574 = vpow2.f32 %v1176_v53  ;;  %v632_v56 = vadd.f32 %v631_v14, %v2165_v49 }
 0x24f   : > { %v1177_v57 = vmul.f32 -1.442695, %v632_v56  ;;  %v635_v3 = vpop.f32.mrb[4].mxu1 }
 0x250   : > { %v637_v59 = vpop.f32.mrb[5].mxu1  ;;  %v636_v18 = vadd.f32 %v635_v3, %v2173_v58 }
 0x251   : > { %1576 = vpow2.f32 %v1177_v57  ;;  %v638_v60 = vadd.f32 %v637_v59, %v2165_v49 }
 0x253   : > { %v1178_v61 = vmul.f32 -1.442695, %v638_v60  ;;  %v641_v62 = vpop.f32.mrb[6].mxu1 }
 0x254   : > { %v643_v4 = vpop.f32.mrb[7].mxu1  ;;  %v642_v25 = vadd.f32 %v641_v62, %v2173_v58 }
 0x255   : > { %1578 = vpow2.f32 %v1178_v61  ;;  %v644_v5 = vadd.f32 %v643_v4, %v2165_v49 }
 0x256   : > { %1580 = vtanh.f32 %v624_v63 }
 0x257   : > { %v1575_v6 = vpop.eup %1574  ;;  %v1179_v7 = vmul.f32 -1.442695, %v644_v5  ;;  %v647_v8 = vpop.f32.mrb[8].mxu1 }
 0x258   : > { %v782_v9 = vadd.f32 1.0, %v1575_v6  ;;  %v649_v10 = vpop.f32.mrb[9].mxu1  ;;  %v648_v34 = vadd.f32 %v647_v8, %v2173_v58 }
 0x259   : > { %1582 = vpow2.f32 %v1179_v7  ;;  %v650_v11 = vadd.f32 %v649_v10, %v2165_v49 }
 0x25a   : > { %1584 = vrcp.f32 %v782_v9 }
 0x25b   : > { %v1577_v12 = vpop.eup %1576  ;;  %v1180_v13 = vmul.f32 -1.442695, %v650_v11  ;;  %v653_v16 = vpop.f32.mrb[10].mxu1  ;;  %1586 = vtanh.f32 %v630_v1 }
 0x25c   : > { %v783_v17 = vadd.f32 1.0, %v1577_v12  ;;  %v655_v19 = vpop.f32.mrb[11].mxu1  ;;  %v654_v44 = vadd.f32 %v653_v16, %v2173_v58 }
 0x25d   : > { %1588 = vpow2.f32 %v1180_v13  ;;  %v656_v20 = vadd.f32 %v655_v19, %v2165_v49 }
 0x25e   : > { %1590 = vrcp.f32 %v783_v17 }
 0x25f   : > { %v1579_v21 = vpop.eup %1578  ;;  %v1181_v22 = vmul.f32 -1.442695, %v656_v20  ;;  %v659_v23 = vpop.f32.mrb[12].mxu1  ;;  %1592 = vtanh.f32 %v636_v18 }
 0x260   : > { %v784_v24 = vadd.f32 1.0, %v1579_v21  ;;  %v661_v26 = vpop.f32.mrb[13].mxu1  ;;  %v1581_v28 = vpop.eup %1580  ;;  %v660_v14 = vadd.f32 %v659_v23, %v2173_v58 }
 0x261   : > { %1594 = vpow2.f32 %v1181_v22  ;;  %v662_v27 = vadd.f32 %v661_v26, %v2165_v49 }
 0x262   : > { %1596 = vrcp.f32 %v784_v24 }
 0x263   : > { %v1583_v29 = vpop.eup %1582  ;;  %v1182_v30 = vmul.f32 -1.442695, %v662_v27  ;;  %v665_v31 = vpop.f32.mrb[14].mxu1  ;;  %1598 = vtanh.f32 %v642_v25 }
 0x264   : > { %v1585_v32 = vpop.eup %1584  ;;  %v785_v33 = vadd.f32 1.0, %v1583_v29  ;;  %v667_v35 = vpop.f32.mrb[15].mxu1  ;;  %v666_v5 = vadd.f32 %v665_v31, %v2173_v58 }
 0x265   : > { %1600 = vpow2.f32 %v1182_v30  ;;  %v668_v36 = vadd.f32 %v667_v35, %v2165_v49  ;;  %v830_v37 = vmul.f32 %v1585_v32, %v1581_v28  ;;  %v1587_v38 = vpop.eup %1586 }
 0x266   : > { %1602 = vrcp.f32 %v785_v33 }
 0x267   : > { %v1589_v39 = vpop.eup %1588  ;;  %v1183_v40 = vmul.f32 -1.442695, %v668_v36  ;;  %v671_v41 = vpop.f32.mrb[16].mxu1  ;;  %1604 = vtanh.f32 %v648_v34 }
 0x268   : > { %v1591_v42 = vpop.eup %1590  ;;  %v786_v43 = vadd.f32 1.0, %v1589_v39  ;;  %v673_v45 = vpop.f32.mrb[17].mxu1  ;;  %v672_v17 = vadd.f32 %v671_v41, %v2173_v58 }
 0x269   : > { %1606 = vpow2.f32 %v1183_v40  ;;  %v674_v46 = vadd.f32 %v673_v45, %v2165_v49  ;;  %v831_v47 = vmul.f32 %v1591_v42, %v1587_v38  ;;  %v1593_v48 = vpop.eup %1592 }
 0x26a   : > { %1608 = vrcp.f32 %v786_v43 }
 0x26b   : > { %v1595_v0 = vpop.eup %1594  ;;  %v1184_v50 = vmul.f32 -1.442695, %v674_v46  ;;  %v677_v51 = vpop.f32.mrb[18].mxu1  ;;  %v1447_v52 = vpack.c.bf16 %v831_v47, %v830_v37  ;;  %1610 = vtanh.f32 %v654_v44 }
 0x26c   : > { %v1597_v53 = vpop.eup %1596  ;;  %v787_v54 = vadd.f32 1.0, %v1595_v0  ;;  %v679_v56 = vpop.f32.mrb[19].mxu1  ;;  %v678_v27 = vadd.f32 %v677_v51, %v2173_v58 }
 0x26d   : > { %1612 = vpow2.f32 %v1184_v50  ;;  %v680_v57 = vadd.f32 %v679_v56, %v2165_v49  ;;  %1448 = vmatpush3.bf16.xpose.msra.mxu0 %v1447_v52  ;;  %v832_v3 = vmul.f32 %v1597_v53, %v1593_v48  ;;  %v1599_v59 = vpop.eup %1598 }
 0x26e   : > { %1614 = vrcp.f32 %v787_v54  ;;  %1449 = vmatprep.subr.bf16.mxu0 %v1845_v15 }
 0x26f   : > { %v1601_v60 = vpop.eup %1600  ;;  %v1185_v61 = vmul.f32 -1.442695, %v680_v57  ;;  %v683_v62 = vpop.f32.mrb[20].mxu1  ;;  %1616 = vtanh.f32 %v660_v14 }
 0x270   : > { %v1603_v63 = vpop.eup %1602  ;;  %v788_v4 = vadd.f32 1.0, %v1601_v60  ;;  %v685_v6 = vpop.f32.mrb[21].mxu1  ;;  %v684_v38 = vadd.f32 %v683_v62, %v2173_v58 }
 0x271   : > { %1618 = vpow2.f32 %v1185_v61  ;;  %v686_v7 = vadd.f32 %v685_v6, %v2165_v49  ;;  %v833_v8 = vmul.f32 %v1603_v63, %v1599_v59  ;;  %v1605_v9 = vpop.eup %1604 }
 0x272   : > { %1620 = vrcp.f32 %v788_v4 }
 0x273   : > { %v1607_v1 = vpop.eup %1606  ;;  %v1186_v10 = vmul.f32 -1.442695, %v686_v7  ;;  %v689_v11 = vpop.f32.mrb[22].mxu1  ;;  %v1450_v12 = vpack.c.bf16 %v833_v8, %v832_v3  ;;  %1622 = vtanh.f32 %v666_v5 }
 0x274   : > { %v1609_v13 = vpop.eup %1608  ;;  %v789_v16 = vadd.f32 1.0, %v1607_v1  ;;  %v691_v18 = vpop.f32.mrb[23].mxu1  ;;  %v690_v48 = vadd.f32 %v689_v11, %v2173_v58 }
 0x275   : > { %1624 = vpow2.f32 %v1186_v10  ;;  %v692_v19 = vadd.f32 %v691_v18, %v2165_v49  ;;  %1451 = vmatpush3.bf16.xpose.msra.mxu0 %v1450_v12  ;;  %v834_v20 = vmul.f32 %v1609_v13, %v1605_v9  ;;  %v1611_v21 = vpop.eup %1610 }
 0x276   : > { %1626 = vrcp.f32 %v789_v16  ;;  %1452 = vmatprep.subr.bf16.mxu0 %v1845_v15 }
 0x277   : > { %v1613_v22 = vpop.eup %1612  ;;  %v1187_v23 = vmul.f32 -1.442695, %v692_v19  ;;  %v695_v24 = vpop.f32.mrb[24].mxu1  ;;  %1628 = vtanh.f32 %v672_v17 }
 0x278   : > { %v1615_v25 = vpop.eup %1614  ;;  %v790_v26 = vadd.f32 1.0, %v1613_v22  ;;  %v697_v28 = vpop.f32.mrb[25].mxu1  ;;  %v696_v59 = vadd.f32 %v695_v24, %v2173_v58 }
 0x279   : > { %1630 = vpow2.f32 %v1187_v23  ;;  %v698_v29 = vadd.f32 %v697_v28, %v2165_v49  ;;  %v835_v30 = vmul.f32 %v1615_v25, %v1611_v21  ;;  %v1617_v31 = vpop.eup %1616 }
 0x27a   : > { %1632 = vrcp.f32 %v790_v26 }
 0x27b   : > { %v1619_v32 = vpop.eup %1618  ;;  %v1188_v33 = vmul.f32 -1.442695, %v698_v29  ;;  %v701_v34 = vpop.f32.mrb[26].mxu1  ;;  %v1453_v35 = vpack.c.bf16 %v835_v30, %v834_v20  ;;  %1634 = vtanh.f32 %v678_v27 }
 0x27c   : > { %v1621_v36 = vpop.eup %1620  ;;  %v791_v37 = vadd.f32 1.0, %v1619_v32  ;;  %v703_v39 = vpop.f32.mrb[27].mxu1  ;;  %v702_v8 = vadd.f32 %v701_v34, %v2173_v58 }
 0x27d   : > { %1636 = vpow2.f32 %v1188_v33  ;;  %v704_v40 = vadd.f32 %v703_v39, %v2165_v49  ;;  %1454 = vmatpush3.bf16.xpose.msra.mxu0 %v1453_v35  ;;  %v836_v41 = vmul.f32 %v1621_v36, %v1617_v31  ;;  %v1623_v42 = vpop.eup %1622  ;;  %v849_v39 = vpop.permute.xlu0 %848 }
 0x27e   : > { %1638 = vrcp.f32 %v791_v37  ;;  %1455 = vmatprep.subr.bf16.mxu0 %v1845_v15 }
 0x27f   : > { %v1625_v43 = vpop.eup %1624  ;;  %v1189_v44 = vmul.f32 -1.442695, %v704_v40  ;;  %v707_v45 = vpop.f32.mrb[28].mxu1  ;;  %1640 = vtanh.f32 %v684_v38  ;;  %v854_v40 = vrot.slane %v849_v39, %v2168_v55 }
 0x280   : > { %v1627_v46 = vpop.eup %1626  ;;  %v792_v47 = vadd.f32 1.0, %v1625_v43  ;;  %v709_v0 = vpop.f32.mrb[29].mxu1  ;;  %v708_v13 = vadd.f32 %v707_v45, %v2173_v58 }
 0x281   : > { %1642 = vpow2.f32 %v1189_v44  ;;  %v710_v50 = vadd.f32 %v709_v0, %v2165_v49  ;;  %v837_v51 = vmul.f32 %v1627_v46, %v1623_v42  ;;  %v1629_v52 = vpop.eup %1628 }
 0x282   : > { %1644 = vrcp.f32 %v792_v47 }
 0x283   : > { %v1631_v53 = vpop.eup %1630  ;;  %v1190_v54 = vmul.f32 -1.442695, %v710_v50  ;;  %v713_v14 = vpop.f32.mrb[30].mxu1  ;;  %v1456_v56 = vpack.c.bf16 %v837_v51, %v836_v41  ;;  %1646 = vtanh.f32 %v690_v48 }
 0x284   : > { %v1633_v57 = vpop.eup %1632  ;;  %v793_v3 = vadd.f32 1.0, %v1631_v53  ;;  %v715_v60 = vpop.f32.mrb[31].mxu1  ;;  %v714_v21 = vadd.f32 %v713_v14, %v2173_v58  ;;  %v947_v14 = vld [vmem:[#allocation3] sm:$0x1] }
 0x285   : > { %1648 = vpow2.f32 %v1190_v54  ;;  %v716_v61 = vadd.f32 %v715_v60, %v2165_v49  ;;  %1457 = vmatpush3.bf16.xpose.msra.mxu0 %v1456_v56  ;;  %v838_v62 = vmul.f32 %v1633_v57, %v1629_v52  ;;  %v1635_v63 = vpop.eup %1634 }
 0x286   : > { %1650 = vrcp.f32 %v793_v3  ;;  %1458 = vmatprep.subr.bf16.mxu0 %v1845_v15 }
 0x287   : > { %v1637_v4 = vpop.eup %1636  ;;  %v1191_v5 = vmul.f32 -1.442695, %v716_v61  ;;  %1652 = vtanh.f32 %v696_v59  ;;  %v955_v61 = vld [vmem:[#allocation4] sm:$0x1] }
 0x288   : > { %v1639_v6 = vpop.eup %1638  ;;  %v794_v7 = vadd.f32 1.0, %v1637_v4 }
 0x289   : > { %1654 = vpow2.f32 %v1191_v5  ;;  %v839_v9 = vmul.f32 %v1639_v6, %v1635_v63  ;;  %v1641_v1 = vpop.eup %1640 }
 0x28a   : > { %1656 = vrcp.f32 %v794_v7  ;;  %v1848_v7 = vmov (!%p1192_p2), 0  }
 0x28b   : > { %v1643_v10 = vpop.eup %1642  ;;  %v1459_v11 = vpack.c.bf16 %v839_v9, %v838_v62  ;;  %1658 = vtanh.f32 %v702_v8 }
 0x28c   : > { %v1645_v49 = vpop.eup %1644  ;;  %v795_v12 = vadd.f32 1.0, %v1643_v10 }
 0x28d   : > { %1460 = vmatpush3.bf16.xpose.msra.mxu0 %v1459_v11  ;;  %v840_v16 = vmul.f32 %v1645_v49, %v1641_v1  ;;  %v1647_v17 = vpop.eup %1646 }
 0x28e   : > { %1660 = vrcp.f32 %v795_v12  ;;  %1461 = vmatprep.subr.bf16.mxu0 %v1845_v15 }
 0x28f   : > { %v1649_v18 = vpop.eup %1648  ;;  %1662 = vtanh.f32 %v708_v13 }
 0x290   : > { %v1651_v19 = vpop.eup %1650  ;;  %v796_v20 = vadd.f32 1.0, %v1649_v18 }
 0x291   : > { %v841_v22 = vmul.f32 %v1651_v19, %v1647_v17  ;;  %v1653_v23 = vpop.eup %1652 }
 0x292   : > { %1664 = vrcp.f32 %v796_v20 }
 0x293   : > { %v1655_v24 = vpop.eup %1654  ;;  %v1462_v25 = vpack.c.bf16 %v841_v22, %v840_v16  ;;  %1666 = vtanh.f32 %v714_v21 }
 0x294   : > { %v1657_v26 = vpop.eup %1656  ;;  %v797_v27 = vadd.f32 1.0, %v1655_v24 }
 0x295   : > { %1463 = vmatpush3.bf16.xpose.msra.mxu0 %v1462_v25  ;;  %v842_v28 = vmul.f32 %v1657_v26, %v1653_v23  ;;  %v1659_v29 = vpop.eup %1658 }
 0x296   : > { %1668 = vrcp.f32 %v797_v27  ;;  %1464 = vmatprep.subr.bf16.mxu0 %v1845_v15 }
 0x298   : > { %v1661_v30 = vpop.eup %1660 }
 0x299   : > { %v843_v31 = vmul.f32 %v1661_v30, %v1659_v29  ;;  %v1663_v32 = vpop.eup %1662 }
 0x29b   : > { %v1465_v33 = vpack.c.bf16 %v843_v31, %v842_v28 }
 0x29c   : > { %v1665_v34 = vpop.eup %1664 }
 0x29d   : > { %1466 = vmatpush3.bf16.xpose.msra.mxu0 %v1465_v33  ;;  %v844_v58 = vmul.f32 %v1665_v34, %v1663_v32  ;;  %v1667_v35 = vpop.eup %1666 }
 0x29e   : > { %1467 = vmatprep.subr.bf16.mxu0 %v1845_v15  ;;  %v926_v15 = vld [vmem:[#allocation2] sm:$0x1] }
 0x2a0   : > { %v1669_v36 = vpop.eup %1668 }
 0x2a1   : > { %v845_v37 = vmul.f32 %v1669_v36, %v1667_v35 }
 0x2a3   : > { %v1468_v38 = vpack.c.bf16 %v845_v37, %v844_v58 }
 0x2a5   : > { %1469 = vmatpush3.bf16.xpose.msra.mxu0 %v1468_v38 }
 0x2ac   : > { %1345 = vmatmul.mubr.f32.vlgmr.msra.gmra.mrb[32].mxu0 %v2078_v2 }
 0x37f   : > { %v921_v41 = vpop.f32.mrb[32].mxu0 }
 0x380   : > { %v922_v42 = vadd.f32 %v921_v41, %v854_v40  ;;  %v1346_v43 = vpop.f32.mrb[33].mxu0 }
 0x382   : > { %925 = vst [vmem:[%s267_s30] sm:$0x1] %v922_v42  ;;  %v928_v44 = vsel %vm927_vm2, %v922_v42, -inf }
 0x383   : > { %929 = vmax.xlane.f32.xlu0 %v928_v44 }
 0x410   : > { %v930_v45 = vpop.xlane.xlu0 %929 }
 0x411   : > { %v931_v46 = vmax.f32 %v926_v15, %v930_v45 }
 0x413   : > { %v932_v47 = vsub.f32 %v926_v15, %v931_v46  ;;  %1038 = vst.msk [vmem:[#allocation2] sm:$0x1] %vm953_vm3, %v931_v46  ;;  %937 = vperm.xlu1 %1573, %v931_v46  }
 0x415   : > { %v933_v2 = vmul.f32 1.442695, %v932_v47 }
 0x417   : > { %1670 = vpow2.f32 %v933_v2 }
 0x421   : > { %v1671_v48 = vpop.eup %1670 }
 0x422   : > { %958 = vperm.xlu0 %1572, %v1671_v48   ;;  %v948_v56 = vmul.f32 %v1671_v48, %v947_v14 }
 0x426   : > { %1674 = vset.pattern.permute.xlu0 (!%p1192_p2), %v1848_v7 }
 0x492   : > { %v938_v0 = vpop.permute.xlu1 %937 }
 0x493   : > { %v943_v50 = vrot.slane %v938_v0, %v2168_v55 }
 0x495   : > { %v944_v51 = vsub.f32 %v922_v42, %v943_v50 }
 0x497   : > { %v945_v52 = vmul.f32 1.442695, %v944_v51 }
 0x499   : > { %1672 = vpow2.f32 %v945_v52 }
 0x4a1   : > { %v959_v59 = vpop.permute.xlu0 %958 }
 0x4a2   : > { %v964_v60 = vrot.slane %v959_v59, %v2168_v55 }
 0x4a3   : > { %v1673_v53 = vpop.eup %1672 }
 0x4a4   : > { %1380 = vmatmul.mubr.f32.vlgmr.msra.gmra.mrb[32].mxu1 %v1673_v53  ;;  %v949_v54 = vsel %vm927_vm2, %v1673_v53, 0.0  ;;  %v965_v62 = vmul.f32 %v964_v60, %v955_v61 }
 0x4a5   : > { %950 = vadd.xlane.f32.xlu1 %v949_v54 }
 0x532   : > { %v951_v57 = vpop.xlane.xlu1 %950 }
 0x533   : > { %v952_v3 = vadd.f32 %v951_v57, %v948_v56 }
 0x535   : > { %954 = vst.msk [vmem:[#allocation3] sm:$0x1] %vm953_vm3, %v952_v3 }
 0x53c   : > { %v1044_v6 = vld [vmem:[#allocation3] sm:$0x1] (!%p1192_p2) }
 0x53d   : > { %1047 = vperm.xlu0 (!%p1192_p2), %1674, %v1044_v6  }
 0x574   : > { %1042 = sbr.rel (%p1192_p2) target bundleno = 1485 (0x5cd), region = 56 }
 0x577   : > { %v1032_v63 = vpop.f32.mrb[32].mxu1 }
 0x578   : > { %v1036_v4 = vadd.f32 %v1032_v63, %v965_v62  ;;  %v1381_v5 = vpop.f32.mrb[33].mxu1 }
 0x57a   : > { %1037 = vst [vmem:[#allocation4] sm:$0x1] %v1036_v4 }
 0x581   : > { %v1043_v1 = vld [vmem:[#allocation4] sm:$0x1] }
 0x5bc   : > { %v1048_v8 = vpop.permute.xlu0 %1047 }
 0x5bd   : > { %v1053_v9 = vrot.slane %v1048_v8, %v2168_v55 }
 0x5bf   : > { %1675 = vrcp.f32 %v1053_v9 }
 0x5c9   : > { %v1676_v10 = vpop.eup %1675 }
 0x5ca   : > { %v1055_v11 = vmul.f32 %v1676_v10, %v1043_v1 }
 0x5cc   : > { %1056 = vst [vmem:[%s2275_s5] sm:$0x1] %v1055_v11 }
 0x5cd PF: > { %s1193_s7 = sshll.u32 %s1901_s22, 4  ;;  %s1070_s26 = sshll.u32 %s267_s30, 4  ;;  %s1071_s26 = int_to_ptr.vmem [resolvable:$true] %s1070_s26 }
 0x5ce   : > { %s2231_s9 = scalar_lea.hbm %s2274_s4, %s1193_s7  ;;  %s1058_s12 = scalar_lea.sflag [#allocation7], %s2051_s17 }
 0x5cf   : > { %s1763_s13 = scalar_lea.vmem %s1071_s26, 16  ;;  %s1849_s10 = smov [#allocation11]  }
 0x5d0   : > { %p1764_p4 = scmp.ne.s32.totalorder %s1071_s26, %s1763_s13  ;;  %s1767_s28 = sshll.u32 %s1849_s10, 4  ;;  %s1768_s28 = int_to_ptr.vmem [resolvable:$false] %s1767_s28 }
 0x5d1   : > { %s1769_s24 = scalar_lea.vmem %s1768_s28, 32  ;;  %p1770_p3 = scmp.lt.s32.totalorder %s1071_s26, %s1768_s28 }
 0x5d2   : > { %p1765_p9 = pnand %p1764_p4, %p1999_p6  ;;  %p1771_p7 = scmp.lt.s32.totalorder %s1769_s24, %s1763_s13 }
 0x5d4   : > { %p1766_p12 = pneg %p1765_p9  ;;  %p1772_p10 = por %p1771_p7, %p1770_p3 }
 0x5d6   : > { %p1773_p13 = pnand %p1772_p10, %p1766_p12 }
 0x5d8   : > { %1776 = shalt.err (!%p1773_p13)
}
 0x5d9   : > { %s1777_s22 = scalar_lea.hbm %s2231_s9, 16  ;;  %s1781_s15 = scalar_lea.hbm %s2274_s4, 64 }
 0x5da   : > { %p1778_p0 = scmp.ne.s32.totalorder %s2231_s9, %s1777_s22  ;;  %p1782_p8 = scmp.lt.u32.totalorder %s2231_s9, %s2274_s4 }
 0x5db   : > { %p1783_p1 = scmp.lt.u32.totalorder %s1781_s15, %s1777_s22  ;;  %p1785_p4 = scmp.lt.u32.totalorder %s1777_s22, %s2231_s9 }
 0x5dc   : > { %p1779_p5 = pnand %p1778_p0, %p1999_p6 }
 0x5dd   : > { %p1784_p2 = por %p1783_p1, %p1782_p8 }
 0x5de   : > { %p1780_p11 = pneg %p1779_p5 }
 0x5df   : > { %p1786_p9 = por %p1785_p4, %p1784_p2 }
 0x5e1   : > { %p1787_p12 = pnand %p1786_p9, %p1780_p11 }
 0x5e3   : > { %1790 = shalt.err (!%p1787_p12)
}
 0x5e4   : > { %1504 = dma.vmem_to_hbm [thread:$0]  (%p1999_p6), %s1071_s26, 16, %s2231_s9, %s1058_s12  }
 0x5e5 PF: > { %p1526_p3 = scmp.ge.s32.totalorder %s1833_s21, 2  ;;  %s1088_s23 = sand.u32 1, %s1821_s18  }
 0x5e6   : > { %p2291_p7 = scmp.ne.s32.totalorder %s2280_s25, 0  ;;  %s1089_s7 = scalar_lea.sflag [#allocation7], %s1088_s23 }
 0x5e8   : > { %p1518_p10 = pnand %p1526_p3, %p2291_p7 }
 0x5ea   : > { %1816 = dma.done.wait (!%p1518_p10), %s1089_s7, 16  }
 0x5eb   : > { %1818 = vsyncadd (!%p1518_p10), %s1089_s7, 4294967280  ;;  %p20_p13 = scmp.ge.s32.totalorder %s1986_s16, 6   ;;  %s2292_s18 = smov %s1825_s19 }
 0x5ec   : > { %s2293_s19 = smov %s1829_s20  ;;  %s2294_s20 = smov %s1995_s27 }
 0x5ed   : > { %s2295_s21 = smov %s1986_s16  ;;  %22 = sbr.rel (!%p20_p13) target bundleno = 6 (0x6), region = 105 }
 0x5f4   :  { %1093 = vsyncpa [#allocation6], 1 }
 0x5f5   :  { %1095 = vsyncpa [#allocation6 + $0x1], 1 }
 0x5f6   :  { %1096 = vsyncpa [#allocation9], 1 }
 0x5f7   :  { %1097 = vsyncpa [#allocation7], 1 }
 0x5f8   :  { %1099 = vsyncpa [#allocation7 + $0x1], 1 }

</bundles_post_ra>
